<compile_context>
chip_gen: v6e
topology: v6e:2x2x1
jax: 0.10.0
libtpu: 0.0.40
codegen_flags: <defaults>
</compile_context>

<pallas_src>
import numpy as np
import jax
import jax.numpy as jnp
from jax.experimental import pallas as pl
from jax.experimental.pallas import tpu as pltpu

_NEG_FILL = -1e9  # padding value for logit columns/rows (safe for f32 and bf16)


def _round_up(v, m):
    return ((v + m - 1) // m) * m


def _csce_kernel(x_ref, tgt_ref, w_ref, o_ref):
    # x_ref:   (TN, CP)   logits tile (any float dtype; widened to f32 here)
    # tgt_ref: (TN, 1)    int32 target class per row
    # w_ref:   (1,  CP)   f32 per-class CE weights (0 on padded classes)
    # o_ref:   (1, 8, 128) f32 lane-dense partial output:
    #          lane 0 -> partial weighted-NLL sum, lane 1 -> partial weight sum
    x = x_ref[...].astype(jnp.float32)
    tgt = tgt_ref[...]
    w = w_ref[...]

    tn, cp = x.shape
    # Rebuild the one-hot mask in-kernel (single mask reused for all reductions).
    col = jax.lax.broadcasted_iota(jnp.int32, (tn, cp), 1)
    mask = (col == tgt).astype(jnp.float32)                      # (TN, CP)

    # Numerically stable log-softmax + NLL on the target class.
    mx = jnp.max(x, axis=-1, keepdims=True)                      # (TN, 1)
    lse = jnp.log(jnp.sum(jnp.exp(x - mx), axis=-1, keepdims=True)) + mx
    tgt_logit = jnp.sum(mask * x, axis=-1, keepdims=True)        # (TN, 1)
    nll = lse - tgt_logit                                        # (TN, 1)

    # Per-row class weight; padded rows hit a zero-weight (or absent) class.
    wi = jnp.sum(mask * w, axis=-1, keepdims=True)               # (TN, 1)

    num = jnp.sum(wi * nll)                                      # scalar partial
    den = jnp.sum(wi)                                            # scalar partial

    lane = jax.lax.broadcasted_iota(jnp.int32, (1, 8, 128), 2)
    o_ref[...] = jnp.where(lane == 0, num, 0.0) + jnp.where(lane == 1, den, 0.0)


def csce_loss_pallas(x, target, weight=None, tile_n=256):
    """x: (N, C) float logits; target: (N,) int; weight: (C,) f32 or None."""
    n, c = x.shape
    c_pad = _round_up(max(c, 128), 128)
    tn = min(tile_n, _round_up(n, 8))
    n_pad = _round_up(n, tn)
    num_blocks = n_pad // tn

    # ---- pad logits (large negative so padded lanes never matter) ----
    if n_pad != n or c_pad != c:
        xp = jnp.full((n_pad, c_pad), _NEG_FILL, dtype=x.dtype)
        xp = xp.at[:n, :c].set(x)
    else:
        xp = x

    # ---- targets as a tiny int32 column; padded rows -> class `c` (weight 0) ----
    tgt32 = target.astype(jnp.int32)
    if n_pad != n:
        tp = jnp.full((n_pad, 1), c, dtype=jnp.int32)
        tp = tp.at[:n, 0].set(tgt32)
    else:
        tp = tgt32.reshape(n, 1)

    # ---- per-class weights, padded classes get weight 0 ----
    w = jnp.ones((c,), jnp.float32) if weight is None else weight.astype(jnp.float32)
    wp = jnp.zeros((1, c_pad), jnp.float32).at[0, :c].set(w)

    itemsize = int(jnp.dtype(x.dtype).itemsize)
    cost = pl.CostEstimate(
        flops=int(6 * n_pad * c_pad),
        transcendentals=int(n_pad * c_pad),
        bytes_accessed=int(n_pad * c_pad * itemsize + n_pad * 4 + c_pad * 4
                           + num_blocks * 8 * 128 * 4),
    )

    partials = pl.pallas_call(
        _csce_kernel,
        out_shape=jax.ShapeDtypeStruct((num_blocks, 8, 128), jnp.float32),
        grid=(num_blocks,),
        in_specs=[
            pl.BlockSpec((tn, c_pad), lambda i: (i, 0)),   # logits tile
            pl.BlockSpec((tn, 1), lambda i: (i, 0)),       # targets column
            pl.BlockSpec((1, c_pad), lambda i: (0, 0)),    # class weights (resident)
        ],
        out_specs=pl.BlockSpec((1, 8, 128), lambda i: (i, 0, 0)),
        compiler_params=pltpu.CompilerParams(
            dimension_semantics=("parallel",),             # shard rows across TCs (v7x)
        ),
        cost_estimate=cost,
    )(xp, tp, wp)

    num = jnp.sum(partials[:, 0, 0])
    den = jnp.sum(partials[:, 0, 1])
    return num / den


class CSCEPallas:
    """Mirror of the PyTorch CSCE module (deterministic, framework-free init)."""

    def __init__(self, num_class_list, drw_epoch=5, scheduler="drw"):
        self.num_class_list = np.asarray(num_class_list, dtype=np.float64)
        self.step_epoch = drw_epoch
        if scheduler == "drw":
            self.betas = [0.0, 0.999999]
        else:  # 'default'
            self.betas = [0.999999, 0.999999]
        self.weight = None

    def update_weight(self, beta):
        effective_num = 1.0 - np.power(beta, self.num_class_list)
        per_cls_weights = (1.0 - beta) / np.array(effective_num)
        per_cls_weights = (per_cls_weights / np.sum(per_cls_weights)
                           * len(self.num_class_list))
        self.weight = jnp.asarray(per_cls_weights, dtype=jnp.float32)

    def reset_epoch(self, epoch):
        idx = (epoch - 1) // self.step_epoch
        self.update_weight(self.betas[idx])

    def __call__(self, x, target):
        return csce_loss_pallas(x, target, self.weight)


def _reference(x, target, weight=None):
    """Pure-JAX replica of F.cross_entropy(x, target, weight=weight)."""
    n, c = x.shape
    logp = jax.nn.log_softmax(x.astype(jnp.float32), axis=-1)
    nll = -jnp.take_along_axis(logp, target[:, None].astype(jnp.int32), axis=-1)[:, 0]
    w = jnp.ones((c,), jnp.float32) if weight is None else weight
    wi = w[target]
    return jnp.sum(wi * nll) / jnp.sum(wi)


if __name__ == "__main__":
    key = jax.random.PRNGKey(0)
    N, C = 8, 16  # small shapes: batch=8, num_classes=16

    # deterministic imbalanced class counts (length C)
    num_class_list = np.asarray([500, 400, 320, 250, 200, 160, 125, 100,
                                 80, 64, 50, 40, 32, 25, 20, 16], dtype=np.float64)

    kx, kt = jax.random.split(key)
    x = jax.random.normal(kx, (N, C), dtype=jnp.float32)
    target = jax.random.randint(kt, (N,), 0, C, dtype=jnp.int32)

    loss_mod = CSCEPallas(num_class_list, drw_epoch=5, scheduler="drw")

    # phase 0: weight is None -> plain mean cross-entropy
    loss0 = loss_mod(x, target)
    jax.block_until_ready(loss0)
    ref0 = _reference(x, target, None)
    assert jnp.allclose(loss0, ref0, rtol=1e-5, atol=1e-5), (loss0, ref0)

    # phase 1 (DRW): non-trivial class-balanced weights
    loss_mod.reset_epoch(epoch=6)  # idx = 1 -> beta = 0.999999
    loss1 = loss_mod(x, target)
    jax.block_until_ready(loss1)
    ref1 = _reference(x, target, loss_mod.weight)
    assert jnp.allclose(loss1, ref1, rtol=1e-5, atol=1e-5), (loss1, ref1)

    print("KERNEL_OK")
</pallas_src>

<mosaic_0001>
module attributes {stable_mosaic.version = 11 : i64} {
  func.func @_csce_kernel(%arg0: i32, %arg1: memref<8x128xf32, #tpu.memory_space<vmem>>, %arg2: memref<8x1xi32, #tpu.memory_space<vmem>>, %arg3: memref<1x128xf32, #tpu.memory_space<vmem>>, %arg4: memref<1x8x128xf32, #tpu.memory_space<vmem>>) attributes {dimension_semantics = [#tpu.dimension_semantics<parallel>], iteration_bounds = array<i64: 1>, scalar_prefetch = 0 : i64, scratch_operands = 0 : i64, tpu.core_type = #tpu.core_type<tc>, window_params = [{transform_indices = @transform_0, window_bounds = array<i64: 8, 128>}, {transform_indices = @transform_1, window_bounds = array<i64: 8, 1>}, {pipeline_mode = #tpu.pipeline_mode<synchronous>, transform_indices = @transform_2, window_bounds = array<i64: 1, 128>}, {transform_indices = @transform_3, window_bounds = array<i64: 1, 8, 128>}]} {
    %c0 = arith.constant 0 : index
    %c0_0 = arith.constant 0 : index
    %0 = vector.load %arg1[%c0, %c0_0] : memref<8x128xf32, #tpu.memory_space<vmem>>, vector<8x128xf32>
    %c0_1 = arith.constant 0 : index
    %c0_2 = arith.constant 0 : index
    %1 = vector.load %arg2[%c0_1, %c0_2] : memref<8x1xi32, #tpu.memory_space<vmem>>, vector<8x1xi32>
    %c0_3 = arith.constant 0 : index
    %c0_4 = arith.constant 0 : index
    %2 = vector.load %arg3[%c0_3, %c0_4] : memref<1x128xf32, #tpu.memory_space<vmem>>, vector<1x128xf32>
    %3 = tpu.iota {dimensions = array<i32: 1>} : vector<8x128xi32>
    %4 = vector.broadcast %1 : vector<8x1xi32> to vector<8x128xi32>
    %5 = arith.cmpi eq, %3, %4 : vector<8x128xi32>
    %6 = arith.extui %5 : vector<8x128xi1> to vector<8x128xi32>
    %7 = arith.sitofp %6 : vector<8x128xi32> to vector<8x128xf32>
    %cst = arith.constant dense<0xFF800000> : vector<8xf32>
    %8 = vector.multi_reduction <maximumf>, %0, %cst [1] : vector<8x128xf32> to vector<8xf32>
    %9 = vector.shape_cast %8 : vector<8xf32> to vector<8x1xf32>
    %10 = vector.broadcast %9 : vector<8x1xf32> to vector<8x128xf32>
    %11 = arith.subf %0, %10 : vector<8x128xf32>
    %12 = math.exp %11 : vector<8x128xf32>
    %cst_5 = arith.constant dense<0.000000e+00> : vector<8xf32>
    %13 = vector.multi_reduction <add>, %12, %cst_5 [1] : vector<8x128xf32> to vector<8xf32>
    %14 = vector.shape_cast %13 : vector<8xf32> to vector<8x1xf32>
    %15 = math.log %14 : vector<8x1xf32>
    %16 = arith.addf %15, %9 : vector<8x1xf32>
    %17 = arith.mulf %7, %0 : vector<8x128xf32>
    %cst_6 = arith.constant dense<0.000000e+00> : vector<8xf32>
    %18 = vector.multi_reduction <add>, %17, %cst_6 [1] : vector<8x128xf32> to vector<8xf32>
    %19 = vector.shape_cast %18 : vector<8xf32> to vector<8x1xf32>
    %20 = arith.subf %16, %19 : vector<8x1xf32>
    %21 = vector.broadcast %2 : vector<1x128xf32> to vector<8x128xf32>
    %22 = arith.mulf %7, %21 : vector<8x128xf32>
    %cst_7 = arith.constant dense<0.000000e+00> : vector<8xf32>
    %23 = vector.multi_reduction <add>, %22, %cst_7 [1] : vector<8x128xf32> to vector<8xf32>
    %24 = vector.shape_cast %23 : vector<8xf32> to vector<8x1xf32>
    %25 = arith.mulf %24, %20 : vector<8x1xf32>
    %26 = vector.shape_cast %25 : vector<8x1xf32> to vector<1x8x1xf32>
    %cst_8 = arith.constant dense<0.000000e+00> : vector<1xf32>
    %27 = vector.multi_reduction <add>, %26, %cst_8 [1, 2] : vector<1x8x1xf32> to vector<1xf32>
    %28 = vector.shape_cast %27 : vector<1xf32> to vector<1x1x1xf32>
    %29 = vector.extract %28[0, 0, 0] : f32 from vector<1x1x1xf32>
    %30 = vector.shape_cast %24 : vector<8x1xf32> to vector<1x8x1xf32>
    %cst_9 = arith.constant dense<0.000000e+00> : vector<1xf32>
    %31 = vector.multi_reduction <add>, %30, %cst_9 [1, 2] : vector<1x8x1xf32> to vector<1xf32>
    %32 = vector.shape_cast %31 : vector<1xf32> to vector<1x1x1xf32>
    %33 = vector.extract %32[0, 0, 0] : f32 from vector<1x1x1xf32>
    %34 = tpu.iota {dimensions = array<i32: 2>} : vector<1x8x128xi32>
    %c0_i32 = arith.constant 0 : i32
    %35 = vector.broadcast %c0_i32 : i32 to vector<1x8x128xi32>
    %36 = arith.cmpi eq, %34, %35 : vector<1x8x128xi32>
    %cst_10 = arith.constant 0.000000e+00 : f32
    %37 = vector.broadcast %29 : f32 to vector<1x8x128xf32>
    %38 = vector.broadcast %cst_10 : f32 to vector<1x8x128xf32>
    %39 = arith.select %36, %37, %38 : vector<1x8x128xi1>, vector<1x8x128xf32>
    %c1_i32 = arith.constant 1 : i32
    %40 = vector.broadcast %c1_i32 : i32 to vector<1x8x128xi32>
    %41 = arith.cmpi eq, %34, %40 : vector<1x8x128xi32>
    %cst_11 = arith.constant 0.000000e+00 : f32
    %42 = vector.broadcast %33 : f32 to vector<1x8x128xf32>
    %43 = vector.broadcast %cst_11 : f32 to vector<1x8x128xf32>
    %44 = arith.select %41, %42, %43 : vector<1x8x128xi1>, vector<1x8x128xf32>
    %45 = arith.addf %39, %44 : vector<1x8x128xf32>
    %c0_12 = arith.constant 0 : index
    %c0_13 = arith.constant 0 : index
    %c0_14 = arith.constant 0 : index
    %46 = vector.load %arg4[%c0_12, %c0_13, %c0_14] : memref<1x8x128xf32, #tpu.memory_space<vmem>>, vector<1x8x128xf32>
    tpu.vector_store %arg4[%c0_12, %c0_13, %c0_14], %45 {strides = array<i32>} : memref<1x8x128xf32, #tpu.memory_space<vmem>>, vector<1x8x128xf32>,
    return
  }
  func.func @transform_0(%arg0: i32) -> (i32, i32) {
    %c0_i32 = arith.constant 0 : i32
    %c0_i32_0 = arith.constant 0 : i32
    return %arg0, %c0_i32 : i32, i32
  }
  func.func @transform_1(%arg0: i32) -> (i32, i32) {
    %c0_i32 = arith.constant 0 : i32
    %c0_i32_0 = arith.constant 0 : i32
    return %arg0, %c0_i32 : i32, i32
  }
  func.func @transform_2(%arg0: i32) -> (i32, i32) {
    %c0_i32 = arith.constant 0 : i32
    %c0_i32_0 = arith.constant 0 : i32
    %c0_i32_1 = arith.constant 0 : i32
    return %c0_i32, %c0_i32_0 : i32, i32
  }
  func.func @transform_3(%arg0: i32) -> (i32, i32, i32) {
    %c0_i32 = arith.constant 0 : i32
    %c0_i32_0 = arith.constant 0 : i32
    %c0_i32_1 = arith.constant 0 : i32
    return %arg0, %c0_i32, %c0_i32_0 : i32, i32, i32
  }
}

</mosaic_0001>

<bundles_post_ra>
// kernel: tpu_custom_call.1
= control target key start
LH: loop header
LB: loop body
LE: loop exit
PB: predicated region body
PF: predicated region fallthrough
CT: control target
= control target key end

     0   :  { %s164_s0 = inlined_call_operand.vmem [shape: f32[8,128], index: 0, kind: input, shape index: {}]   ;;  %s165_s1 = inlined_call_operand.vmem [shape: s32[8,1], index: 1, kind: input, shape index: {}]   ;;  %s166_s2 = inlined_call_operand.vmem [shape: f32[1,128], index: 2, kind: input, shape index: {}]   ;;  %s167_s3 = inlined_call_operand.hbm [shape: f32[1,8,128], index: 3, kind: output, shape index: {}]  }
   0x1   :  { %v15_v0 = vld [vmem:[%s164_s0] sm:$0xff] }
   0x2   :  { %8 = vsyncpa [#allocation3], 0  ;;  %26 = vmax.xlane.f32.xlu0 %v15_v0  ;;  %v129_v1 = vmov 0   ;;  %v16_v2 = vld [vmem:[%s165_s1] sm:$0xff]  ;;  %v18_v6 = vlaneseq  ;;  %v130_v9 = vmov 0.0   ;;  %vm50_vm1 = vcmask 7168  }
   0x3   :  { %102 = vset.pattern.permute.xlu0 %v129_v1  ;;  %v94_v13 = vld [vmem:[%s166_s2] ss:$0 sm:$0xff]  ;;  %s131_s17 = smov [#allocation2]  }
   0x4   :  { %v19_v7 = vand.u32 127, %v18_v6  ;;  %s85_s18 = sshll.u32 %s131_s17, 4  ;;  %s86_s18 = int_to_ptr.vmem [resolvable:$true] %s85_s18 }
   0x5   :  { %s107_s19 = scalar_lea.vmem %s86_s18, 128  ;;  %p112_p1 = scmp.lt.s32.totalorder %s86_s18, %s86_s18 }
   0x6   :  { %vm71_vm2 = vcmp.eq.s32.totalorder %v19_v7, 0  ;;  %vm74_vm3 = vcmp.eq.s32.totalorder %v19_v7, 1  ;;  %p108_p0 = scmp.ne.s32.totalorder %s86_s18, %s107_s19  ;;  %p113_p2 = scmp.lt.s32.totalorder %s107_s19, %s107_s19 }
   0x8   :  { %p114_p3 = por %p113_p2, %p112_p1 }
   0xa   :  { %p115_p4 = pnand %p114_p3, %p108_p0 }
  0x18   :  { %21 = vperm.xlu0 %102, %v16_v2  }
  0x8b   :  { %v27_v3 = vpop.xlane.xlu0 %26 }
  0x8c   :  { %v28_v4 = vsub.f32 %v15_v0, %v27_v3 }
  0x8e   :  { %v29_v5 = vmul.f32 1.442695, %v28_v4 }
  0x90   :  { %103 = vpow2.f32 %v29_v5 }
  0x93   :  { %v22_v8 = vpop.permute.xlu0 %21 }
  0x94   :  { %vm23_vm0 = vcmp.eq.s32.totalorder %v19_v7, %v22_v8 }
  0x95   :  { %v93_v10 = vsel %vm23_vm0, 1.0, %v130_v9 }
  0x96   :  { %v36_v12 = vmul.f32 %v93_v10, %v15_v0  ;;  %v46_v14 = vmul.f32 %v94_v13, %v93_v10 }
  0x9d   :  { %v104_v11 = vpop.eup %103 }
  0x9e   :  { %31 = vadd.xlane.f32.xlu1 %v104_v11 }
  0xa2   :  { %37 = vadd.xlane.f32.xlu1 %v36_v12 }
  0xa6   :  { %47 = vadd.xlane.f32.xlu1 %v46_v14 }
 0x127   :  { %v32_v15 = vpop.xlane.xlu1 %31 }
 0x128   :  { %105 = vlog2.f32 %v32_v15 }
 0x12b   :  { %v38_v17 = vpop.xlane.xlu1 %37 }
 0x12f   :  { %v48_v21 = vpop.xlane.xlu1 %47 }
 0x130   :  { %v61_v24 = vsel %vm50_vm1, %v48_v21, 0.0 }
 0x135   :  { %v106_v16 = vpop.eup %105 }
 0x136   :  { %v34_v18 = vmul.f32 0.6931472, %v106_v16 }
 0x138   :  { %v35_v19 = vadd.f32 %v34_v18, %v27_v3 }
 0x13a   :  { %v39_v20 = vsub.f32 %v35_v19, %v38_v17 }
 0x13c   :  { %v49_v22 = vmul.f32 %v48_v21, %v39_v20 }
 0x13e   :  { %v51_v23 = vsel %vm50_vm1, %v49_v22, 0.0 }
 0x13f   :  { %52 = vadd.xlane.f32.xlu1 %v51_v23 }
 0x143   :  { %62 = vadd.xlane.f32.xlu1 %v61_v24 }
 0x1c8   :  { %v53_v25 = vpop.xlane.xlu1 %52 }
 0x1c9   :  { %v54_v26 = vrot.slane %v53_v25, 4 }
 0x1cb   :  { %v55_v27 = vadd.f32 %v54_v26, %v53_v25 }
 0x1cc   :  { %v63_v28 = vpop.xlane.xlu1 %62 }
 0x1cd   :  { %v56_v29 = vrot.slane %v55_v27, 2  ;;  %v64_v30 = vrot.slane %v63_v28, 4 }
 0x1cf   :  { %v65_v31 = vadd.f32 %v64_v30, %v63_v28  ;;  %v57_v32 = vadd.f32 %v56_v29, %v55_v27 }
 0x1d1   :  { %v66_v33 = vrot.slane %v65_v31, 2  ;;  %v58_v34 = vrot.slane %v57_v32, 1 }
 0x1d3   :  { %v67_v35 = vadd.f32 %v66_v33, %v65_v31  ;;  %v59_v36 = vadd.f32 %v58_v34, %v57_v32 }
 0x1d5   :  { %95 = vpush %v59_v36  ;;  %v68_v37 = vrot.slane %v67_v35, 1 }
 0x1d7   :  { %v69_v38 = vadd.f32 %v68_v37, %v67_v35 }
 0x1d9   :  { %97 = vpush %v69_v38 }
 0x206   :  { %s96_s1 = spop %95 }
 0x207   :  { %v72_v39 = vstv %s96_s1 }
 0x208   :  { %v73_v41 = vsel %vm71_vm2, %v72_v39, 0.0 }
 0x20a   :  { %s98_s2 = spop %97 }
 0x20b   :  { %v75_v40 = vstv %s98_s2 }
 0x20c   :  { %v76_v42 = vsel %vm74_vm3, %v75_v40, 0.0 }
 0x20d   :  { %v77_v43 = vadd.f32 %v76_v42, %v73_v41 }
 0x20f   :  { %78 = vst [vmem:[#allocation2] sm:$0xff] %v77_v43 }
 0x210   :  { %118 = shalt.err (!%p115_p4)
}
 0x211   :  { %88 = dma.vmem_to_hbm [thread:$0]  %s86_s18, 128, %s167_s3, [#allocation3]  }
 0x212   :  { %127 = dma.done.wait [#allocation3], 128  }
 0x213   :  { %128 = vsyncadd [#allocation3], 4294967168 }
 0x214   :  { %92 = vsyncpa [#allocation3], 1 }

</bundles_post_ra>
